<compile_context>
chip_gen: v5e
topology: v5e:2x2
jax: 0.10.0
libtpu: 0.0.40
codegen_flags: <defaults>
</compile_context>

<pallas_src>
import jax
import jax.numpy as jnp
from jax.experimental import pallas as pl
from jax.experimental.pallas import tpu as pltpu


def _round_up(x, m):
    return ((x + m - 1) // m) * m


def _pick_tile(dim, target, base):
    """Largest tile <= target that divides `dim` and is a multiple of `base`.
    The wrapper pads `dim` to a multiple of `base`, so the search always
    succeeds; the final return is only a safety net."""
    if dim <= target:
        return dim
    t = (target // base) * base
    while t >= base:
        if dim % t == 0:
            return t
        t -= base
    return dim


# ---------------------------------------------------------------------------
# Kernels
# ---------------------------------------------------------------------------

def _m2r_kernel_nosplit(x_ref, w_ref, b_ref, o_ref):
    # x: (tm, K) bf16   w: (K, tn) bf16   b: (1, tn) f32   o: (tm, tn)
    acc = jnp.dot(x_ref[...], w_ref[...], preferred_element_type=jnp.float32)
    o_ref[...] = (acc + b_ref[...]).astype(o_ref.dtype)


def _m2r_kernel_ksplit(x_ref, w_ref, b_ref, o_ref, acc_ref):
    # Same matmul, but the reduction (K) axis is the last grid axis.
    k = pl.program_id(2)

    @pl.when(k == 0)
    def _init():
        # Fold the bias into the init instead of zeros + a finalize add.
        acc_ref[...] = jnp.broadcast_to(b_ref[...], acc_ref.shape)

    acc_ref[...] += jnp.dot(x_ref[...], w_ref[...],
                            preferred_element_type=jnp.float32)

    @pl.when(k == pl.num_programs(2) - 1)
    def _finalize():
        o_ref[...] = acc_ref[...].astype(o_ref.dtype)


# ---------------------------------------------------------------------------
# One-time parameter fusion (parameter-init time, NOT per forward call)
# ---------------------------------------------------------------------------

def prepare_m2r_params(weights, biases, *, compute_dtype=jnp.bfloat16):
    """Relayout + cast the per-expert parameters once.

    weights: (n_exps, d_in, d_out)  (applied as x @ W_e, i.e. transposed vs
                                     PyTorch's (d_out, d_in) storage)
    biases:  (n_exps, d_out)
    Returns:
      w_cat: (d_in_p, fused_p) compute_dtype, lane axis padded to 128.
      b_cat: (1, fused_p) float32.
    """
    n_exps, d_in, d_out = weights.shape
    fused = n_exps * d_out
    w_cat = jnp.transpose(weights, (1, 0, 2)).reshape(d_in, fused)
    b_cat = biases.reshape(1, fused).astype(jnp.float32)

    fused_p = _round_up(fused, 128)
    d_in_p = d_in if d_in <= 128 else _round_up(d_in, 128)   # full-dim K block is legal when small
    pad_k, pad_f = d_in_p - d_in, fused_p - fused
    if pad_k or pad_f:
        w_cat = jnp.pad(w_cat, ((0, pad_k), (0, pad_f)))
    if pad_f:
        b_cat = jnp.pad(b_cat, ((0, 0), (0, pad_f)))
    return w_cat.astype(compute_dtype), b_cat


# ---------------------------------------------------------------------------
# Forward
# ---------------------------------------------------------------------------

def m2r_layer(x, w_cat, b_cat, n_exps, d_out, *, mode="linear", dropout=0.0,
              tm=512, tn=1024, tk=2048, out_dtype=None):
    """
    x:     (N, d_in)
    w_cat: (d_in_p, fused_p) fused experts from prepare_m2r_params
    b_cat: (1, fused_p) f32
    returns (N, n_exps, d_out) == torch.stack([proj_e(x)], dim=-2)
    """
    if mode != "linear":
        # TODO(synk): implement 'whitening' once modules.Whitening is specified.
        raise NotImplementedError(f"M2RLayer mode {mode!r} not implemented")
    del dropout  # eval-mode forward: dropout is identity

    N, d_in = x.shape
    d_in_p, fused_p = w_cat.shape
    fused = n_exps * d_out
    assert d_in_p >= d_in and fused_p >= fused
    out_dtype = out_dtype or x.dtype
    compute_dtype = w_cat.dtype

    # Wrapper-side padding + cast (x-sized only; weights were prepared once).
    Np = _round_up(N, 16)                       # bf16 sublane tile is 16 rows
    x_p = x
    if Np != N or d_in_p != d_in:
        x_p = jnp.pad(x, ((0, Np - N), (0, d_in_p - d_in)))
    x_p = x_p.astype(compute_dtype)

    # Generation-aware VMEM budget: >=16 MiB headroom under the physical cap.
    try:
        vmem_cap = pltpu.get_tpu_info().vmem_capacity_bytes
    except Exception:
        vmem_cap = 64 << 20
    vmem_limit = max(32 << 20, min(vmem_cap - (16 << 20), 112 << 20))

    # Tile selection.
    tm = _pick_tile(Np, tm, 16)
    tn = _pick_tile(fused_p, tn, 128)

    # Keep both TensorCores busy on v7x: guarantee >=2 parallel grid points
    # when possible (harmless on single-TC v5e/v6e).
    if (Np // tm) * (fused_p // tn) < 2 and tn >= 256:
        tn = _pick_tile(fused_p, tn // 2, 128)

    itemsize = jnp.dtype(compute_dtype).itemsize
    out_itemsize = jnp.dtype(out_dtype).itemsize
    # Working set if the whole reduction stays VMEM-resident
    # (double-buffered inputs + output; bias negligible).
    ws_full_k = (2 * (tm * d_in_p + d_in_p * tn) * itemsize
                 + 2 * tm * tn * out_itemsize)
    split_k = ws_full_k > (vmem_limit // 2)

    cost = pl.CostEstimate(
        flops=2 * Np * d_in_p * fused_p,
        transcendentals=0,
        bytes_accessed=(x_p.size * itemsize + w_cat.size * itemsize
                        + b_cat.size * 4 + Np * fused_p * out_itemsize))

    if not split_k:
        # Single pass over K: no reduction grid axis, no accumulator scratch.
        grid = (Np // tm, fused_p // tn)
        out = pl.pallas_call(
            _m2r_kernel_nosplit,
            out_shape=jax.ShapeDtypeStruct((Np, fused_p), out_dtype),
            grid_spec=pltpu.PrefetchScalarGridSpec(
                num_scalar_prefetch=0,
                grid=grid,
                in_specs=[
                    pl.BlockSpec((tm, d_in_p), lambda i, j: (i, 0)),   # x tile
                    pl.BlockSpec((d_in_p, tn), lambda i, j: (0, j)),   # W_cat tile
                    pl.BlockSpec((1, tn), lambda i, j: (0, j)),        # bias tile
                ],
                out_specs=pl.BlockSpec((tm, tn), lambda i, j: (i, j)),
            ),
            compiler_params=pltpu.CompilerParams(
                dimension_semantics=("parallel", "parallel"),
                vmem_limit_bytes=vmem_limit,
            ),
            cost_estimate=cost,
        )(x_p, w_cat, b_cat)
    else:
        tk = _pick_tile(d_in_p, tk, 128)
        grid = (Np // tm, fused_p // tn, d_in_p // tk)
        out = pl.pallas_call(
            _m2r_kernel_ksplit,
            out_shape=jax.ShapeDtypeStruct((Np, fused_p), out_dtype),
            grid_spec=pltpu.PrefetchScalarGridSpec(
                num_scalar_prefetch=0,
                grid=grid,
                in_specs=[
                    pl.BlockSpec((tm, tk), lambda i, j, k: (i, k)),    # x tile
                    pl.BlockSpec((tk, tn), lambda i, j, k: (k, j)),    # W_cat tile
                    pl.BlockSpec((1, tn), lambda i, j, k: (0, j)),     # bias tile
                ],
                out_specs=pl.BlockSpec((tm, tn), lambda i, j, k: (i, j)),
                scratch_shapes=[pltpu.VMEM((tm, tn), jnp.float32)],
            ),
            compiler_params=pltpu.CompilerParams(
                dimension_semantics=("parallel", "parallel", "arbitrary"),
                vmem_limit_bytes=vmem_limit,
            ),
            cost_estimate=cost,
        )(x_p, w_cat, b_cat)

    # Strip padding; (N, n_exps*d_out) -> (N, n_exps, d_out) is metadata-only.
    return out[:N, :fused].reshape(N, n_exps, d_out)


if __name__ == "__main__":
    # Small shapes consistent with the module's forward: (N, d_in) -> (N, n_exps, d_out)
    N, d_in, d_out, n_exps = 16, 32, 32, 4

    key = jax.random.PRNGKey(0)
    kx, kw, kb = jax.random.split(key, 3)

    x = jax.random.normal(kx, (N, d_in), dtype=jnp.float32)
    # Deterministic nn.Linear-style init (uniform in +-1/sqrt(d_in))
    bound = 1.0 / (d_in ** 0.5)
    weights = jax.random.uniform(kw, (n_exps, d_in, d_out), dtype=jnp.float32,
                                 minval=-bound, maxval=bound)
    biases = jax.random.uniform(kb, (n_exps, d_out), dtype=jnp.float32,
                                minval=-bound, maxval=bound)

    # One-time parameter fusion/cast (module __init__ time, not per forward).
    w_cat, b_cat = prepare_m2r_params(weights, biases)

    out = jax.block_until_ready(m2r_layer(x, w_cat, b_cat, n_exps, d_out))
    assert out.shape == (N, n_exps, d_out), out.shape

    # Pure-JAX f32 reference: stack of per-expert linears.
    ref = jnp.einsum("nd,edo->neo", x, weights) + biases[None, :, :]
    err = float(jnp.max(jnp.abs(out - ref)))
    # bf16 inputs with f32 accumulation: loosened tolerance vs f32 reference.
    assert jnp.allclose(out, ref, atol=5e-2, rtol=5e-2), err

    print("KERNEL_OK")
</pallas_src>

<mosaic_0001>
module attributes {stable_mosaic.version = 11 : i64} {
  func.func @_m2r_kernel_nosplit(%arg0: i32, %arg1: i32, %arg2: memref<16x32xbf16, #tpu.memory_space<vmem>>, %arg3: memref<32x128xbf16, #tpu.memory_space<vmem>>, %arg4: memref<1x128xf32, #tpu.memory_space<vmem>>, %arg5: memref<16x128xf32, #tpu.memory_space<vmem>>) attributes {dimension_semantics = [#tpu.dimension_semantics<parallel>, #tpu.dimension_semantics<parallel>], iteration_bounds = array<i64: 1, 1>, scalar_prefetch = 0 : i64, scratch_operands = 0 : i64, tpu.core_type = #tpu.core_type<tc>, window_params = [{transform_indices = @transform_0, window_bounds = array<i64: 16, 32>}, {transform_indices = @transform_1, window_bounds = array<i64: 32, 128>}, {transform_indices = @transform_2, window_bounds = array<i64: 1, 128>}, {transform_indices = @transform_3, window_bounds = array<i64: 16, 128>}]} {
    %c0 = arith.constant 0 : index
    %c0_0 = arith.constant 0 : index
    %0 = vector.load %arg2[%c0, %c0_0] : memref<16x32xbf16, #tpu.memory_space<vmem>>, vector<16x32xbf16>
    %c0_1 = arith.constant 0 : index
    %c0_2 = arith.constant 0 : index
    %1 = vector.load %arg3[%c0_1, %c0_2] : memref<32x128xbf16, #tpu.memory_space<vmem>>, vector<32x128xbf16>
    %cst = arith.constant dense<0.000000e+00> : vector<16x128xf32>
    %2 = tpu.matmul %0, %1, %cst {dimension_numbers = #tpu.dot_dimension_numbers<[1], [0], [0], [1], [0, 0, 1, 1], [], []>} : vector<16x32xbf16>, vector<32x128xbf16>, vector<16x128xf32> -> vector<16x128xf32>
    %c0_3 = arith.constant 0 : index
    %c0_4 = arith.constant 0 : index
    %3 = vector.load %arg4[%c0_3, %c0_4] : memref<1x128xf32, #tpu.memory_space<vmem>>, vector<1x128xf32>
    %4 = vector.broadcast %3 : vector<1x128xf32> to vector<16x128xf32>
    %5 = arith.addf %2, %4 : vector<16x128xf32>
    %c0_5 = arith.constant 0 : index
    %c0_6 = arith.constant 0 : index
    %6 = vector.load %arg5[%c0_5, %c0_6] : memref<16x128xf32, #tpu.memory_space<vmem>>, vector<16x128xf32>
    tpu.vector_store %arg5[%c0_5, %c0_6], %5 {strides = array<i32>} : memref<16x128xf32, #tpu.memory_space<vmem>>, vector<16x128xf32>,
    return
  }
  func.func @transform_0(%arg0: i32, %arg1: i32) -> (i32, i32) {
    %c0_i32 = arith.constant 0 : i32
    %c0_i32_0 = arith.constant 0 : i32
    return %arg0, %c0_i32 : i32, i32
  }
  func.func @transform_1(%arg0: i32, %arg1: i32) -> (i32, i32) {
    %c0_i32 = arith.constant 0 : i32
    %c0_i32_0 = arith.constant 0 : i32
    return %c0_i32, %arg1 : i32, i32
  }
  func.func @transform_2(%arg0: i32, %arg1: i32) -> (i32, i32) {
    %c0_i32 = arith.constant 0 : i32
    %c0_i32_0 = arith.constant 0 : i32
    return %c0_i32, %arg1 : i32, i32
  }
  func.func @transform_3(%arg0: i32, %arg1: i32) -> (i32, i32) {
    %c0_i32 = arith.constant 0 : i32
    return %arg0, %arg1 : i32, i32
  }
}

</mosaic_0001>

<bundles_post_ra>
// kernel: tpu_custom_call.1
= control target key start
LH: loop header
LB: loop body
LE: loop exit
PB: predicated region body
PF: predicated region fallthrough
CT: control target
= control target key end

     0   :  { %8 = vsyncpa [#allocation3], 0  ;;  %s256_s0 = inlined_call_operand.hbm [shape: bf16[16,32], index: 0, kind: input, shape index: {}]   ;;  %s257_s1 = inlined_call_operand.hbm [shape: bf16[32,128], index: 1, kind: input, shape index: {}]   ;;  %s258_s2 = inlined_call_operand.vmem [shape: f32[1,128], index: 2, kind: input, shape index: {}]   ;;  %s259_s3 = inlined_call_operand.hbm [shape: f32[16,128], index: 3, kind: output, shape index: {}]  }
   0x1   :  { %9 = vsyncpa [#allocation6], 0 }
   0x2   :  { %10 = vsyncpa [#allocation4], 0  ;;  %s15_s14 = sshll.u32 %s256_s0, 4  ;;  %s217_s15 = smov [#allocation2]   ;;  %s16_s14 = int_to_ptr.hbm [resolvable:$true] %s15_s14 }
   0x3   :  { %s17_s16 = sshll.u32 %s217_s15, 4  ;;  %s28_s19 = sshll.u32 %s257_s1, 4  ;;  %s18_s16 = int_to_ptr.vmem [resolvable:$true] %s17_s16  ;;  %s29_s19 = int_to_ptr.hbm [resolvable:$true] %s28_s19 }
   0x4   :  { %s218_s20 = smov 64   ;;  %s219_s21 = smov 4  }
   0x5   :  { %23 = dma.hbm_to_vmem [thread:$0]  %s16_s14, 128, %s18_s16, [#allocation3], %s218_s20, %s218_s20, %s219_s21  }
   0x6   :  { %s220_s22 = smov [#allocation5]  }
   0x7   :  { %s30_s23 = sshll.u32 %s220_s22, 4  ;;  %s31_s23 = int_to_ptr.vmem [resolvable:$true] %s30_s23 }
   0x8   :  { %36 = dma.hbm_to_vmem [thread:$0]  %s29_s19, 256, %s31_s23, [#allocation6], %s218_s20, %s218_s20, %s219_s21  }
   0x9   :  { %211 = dma.done.wait [#allocation3], 128  }
   0xa   :  { %212 = vsyncadd [#allocation3], 4294967168 }
   0xb   :  { %213 = dma.done.wait [#allocation6], 256  }
   0xc   :  { %214 = vsyncadd [#allocation6], 4294967040  ;;  %v130_v0 = vld [vmem:[#allocation5 + $0x8] sm:$0xff]  ;;  %v129_v1 = vld [vmem:[#allocation5] sm:$0xff]  ;;  %vm75_vm0 = vcmask 261120   ;;  %s221_s24 = smov [#allocation7]  }
   0xd   :  { %85 = vmatpush.bf16.msra.mxu0 %v130_v0  ;;  %v128_v2 = vld [vmem:[#allocation2] sm:$0xff]  ;;  %s99_s25 = sshll.u32 %s221_s24, 4  ;;  %s101_s28 = sshll.u32 %s259_s3, 4  ;;  %s100_s25 = int_to_ptr.vmem [resolvable:$true] %s99_s25  ;;  %s102_s28 = int_to_ptr.hbm [resolvable:$true] %s101_s28 }
   0xe   :  { %v138_v3 = vld [vmem:[%s258_s2] ss:$0 sm:$0xff]  ;;  %s222_s29 = smov 128   ;;  %s223_s30 = smov 8  }
  0x11   :  { %86 = vmatpush.bf16.msra.mxu0 %v129_v1 }
  0x14   :  { %127 = vmatmul.msk.bf16.vlgmr.msra.gmra.mxu0 %vm75_vm0, %v128_v2 }
  0x91   :  { %v88_v4 = vpop.f32.mrf.mxu0 }
  0x92   :  { %v89_v5 = vadd.f32 %v138_v3, %v88_v4 }
  0x94   :  { %93 = vst [vmem:[#allocation7] sm:$0xff] %v89_v5 }
  0x99   :  { %v90_v6 = vpop.f32.mrf.mxu0 }
  0x9a   :  { %v91_v7 = vadd.f32 %v138_v3, %v90_v6 }
  0x9c   :  { %94 = vst [vmem:[#allocation7 + $0x8] sm:$0xff] %v91_v7 }
  0x9d   :  { %107 = dma.vmem_to_hbm [thread:$0]  %s100_s25, 256, %s102_s28, [#allocation4], %s222_s29, %s222_s29, %s223_s30  }
  0x9e   :  { %215 = dma.done.wait [#allocation4], 256  }
  0x9f   :  { %216 = vsyncadd [#allocation4], 4294967040 }
  0xa0   :  { %112 = vsyncpa [#allocation3], 1 }
  0xa1   :  { %113 = vsyncpa [#allocation6], 1 }
  0xa2   :  { %114 = vsyncpa [#allocation4], 1 }

</bundles_post_ra>
